<compile_context>
chip_gen: v7x
topology: tpu7x:2x2x1
jax: 0.10.0
libtpu: 0.0.40
codegen_flags: <defaults>
</compile_context>

<pallas_src>
import jax
import jax.numpy as jnp
from jax import lax
from jax.experimental import pallas as pl
from jax.experimental.pallas import tpu as pltpu


def bilstm_dir_kernel(nsteps_ref,                          # scalar prefetch (SMEM)
                      len_ref, x_ref, wih_ref, whh_ref, b_ref,   # inputs
                      out_ref, hid_ref,                           # outputs
                      gx_ref, h_ref, c_ref):                      # scratch
    """One LSTM direction per grid step (grid=(2,): 0 = forward, 1 = backward).

    Kernel-visible shapes (BP = padded batch, H = hidden, T = padded seq len):
      len_ref : (BP, 1)    int32
      x_ref   : (T*BP, H)  bf16   time-major embedded inputs, flattened
      wih_ref : (H, 4H)    bf16   input->gates weights for this direction
      whh_ref : (H, 4H)    bf16   hidden->gates weights for this direction
      b_ref   : (1, 4H)    f32    combined gate bias for this direction
      out_ref : (T, BP, H) f32    per-step hidden outputs for this direction
      hid_ref : (BP, H)    f32    final hidden state for this direction
      gx_ref  : (T*BP, 4H) f32    scratch: precomputed input gate pre-acts
      h_ref, c_ref : (BP, H) f32  scratch: recurrent state
    """
    d = pl.program_id(0)
    n = nsteps_ref[0]                      # dynamic number of real timesteps
    BP, H = h_ref.shape

    # ---- hoisted input projection: one big MXU GEMM for all timesteps ------
    gx_ref[...] = jnp.dot(x_ref[...], wih_ref[...],
                          preferred_element_type=jnp.float32) + b_ref[...]

    # ---- init state, pre-zero outputs (covers padded tail / masked rows) ---
    h_ref[...] = jnp.zeros(h_ref.shape, jnp.float32)
    c_ref[...] = jnp.zeros(c_ref.shape, jnp.float32)
    out_ref[...] = jnp.zeros(out_ref.shape, jnp.float32)

    lengths = len_ref[...]                 # (BP, 1) int32
    whh = whh_ref[...]                     # (H, 4H) bf16, lives in vregs
    is_fwd = d == 0

    def step(s, carry):
        # forward walks t = 0..n-1, backward walks t = n-1..0
        t = jnp.where(is_fwd, s, n - 1 - s)
        row = pl.multiple_of(t * BP, BP)
        g = gx_ref[pl.ds(row, BP), :] + jnp.dot(
            h_ref[...].astype(jnp.bfloat16), whh,
            preferred_element_type=jnp.float32)          # (BP, 4H)
        i = jax.nn.sigmoid(g[:, 0 * H:1 * H])
        f = jax.nn.sigmoid(g[:, 1 * H:2 * H])
        gg = jnp.tanh(g[:, 2 * H:3 * H])
        o = jax.nn.sigmoid(g[:, 3 * H:4 * H])
        c_new = f * c_ref[...] + i * gg
        h_new = o * jnp.tanh(c_new)
        mask = t < lengths                               # (BP, 1) bool
        h_ref[...] = jnp.where(mask, h_new, h_ref[...])
        c_ref[...] = jnp.where(mask, c_new, c_ref[...])
        out_ref[t] = jnp.where(mask, h_new, 0.0)
        return carry

    lax.fori_loop(0, n, step, 0)
    hid_ref[...] = h_ref[...]


def bilstm_pallas(embedded, lengths, params):
    """embedded: (B, T, H) f32, lengths: (B,) int. Returns (output, hidden)."""
    B, T, H = embedded.shape
    w_ih_f, w_hh_f, b_f, w_ih_b, w_hh_b, b_b = params  # (H,4H),(H,4H),(1,4H) x2
    BP = ((B + 7) // 8) * 8                            # pad batch to 8 sublanes

    emb_tm = jnp.transpose(embedded, (1, 0, 2))        # (T, B, H) time-major
    emb_tm = jnp.pad(emb_tm, ((0, 0), (0, BP - B), (0, 0)))
    x_flat = emb_tm.reshape(T * BP, H).astype(jnp.bfloat16)

    lengths_i32 = lengths.astype(jnp.int32)
    lengths_p = jnp.pad(lengths_i32, (0, BP - B)).reshape(BP, 1)
    nsteps = jnp.max(lengths_i32).reshape(1)           # SMEM scalar prefetch

    # Stack the two directions along a leading axis; bf16 for the MXU.
    w_ih = jnp.stack([w_ih_f, w_ih_b]).astype(jnp.bfloat16)   # (2, H, 4H)
    w_hh = jnp.stack([w_hh_f, w_hh_b]).astype(jnp.bfloat16)   # (2, H, 4H)
    bias = jnp.stack([b_f, b_b]).astype(jnp.float32)          # (2, 1, 4H)

    out_tm, hid = pl.pallas_call(
        bilstm_dir_kernel,
        out_shape=(
            jax.ShapeDtypeStruct((2, T, BP, H), jnp.float32),
            jax.ShapeDtypeStruct((2, BP, H), jnp.float32),
        ),
        grid_spec=pltpu.PrefetchScalarGridSpec(
            num_scalar_prefetch=1,
            grid=(2,),                                         # direction axis
            in_specs=[
                pl.BlockSpec((BP, 1), lambda d, n: (0, 0)),            # lengths
                pl.BlockSpec((T * BP, H), lambda d, n: (0, 0)),        # x shared
                pl.BlockSpec((None, H, 4 * H), lambda d, n: (d, 0, 0)),  # W_ih[d]
                pl.BlockSpec((None, H, 4 * H), lambda d, n: (d, 0, 0)),  # W_hh[d]
                pl.BlockSpec((None, 1, 4 * H), lambda d, n: (d, 0, 0)),  # b[d]
            ],
            out_specs=[
                pl.BlockSpec((None, T, BP, H), lambda d, n: (d, 0, 0, 0)),
                pl.BlockSpec((None, BP, H), lambda d, n: (d, 0, 0)),
            ],
            scratch_shapes=[
                pltpu.VMEM((T * BP, 4 * H), jnp.float32),  # precomputed gates
                pltpu.VMEM((BP, H), jnp.float32),          # h state
                pltpu.VMEM((BP, H), jnp.float32),          # c state
            ],
        ),
        compiler_params=pltpu.CompilerParams(
            dimension_semantics=("parallel",)),            # 2 TCs on v7x
    )(nsteps, lengths_p, x_flat, w_ih, w_hh, bias)

    out_f = out_tm[0, :, :B, :]                            # (T, B, H)
    out_b = out_tm[1, :, :B, :]
    output = jnp.transpose(jnp.concatenate([out_f, out_b], axis=-1), (1, 0, 2))
    hidden = hid[:, :B, :]                                 # (2, B, H)
    return output, hidden


def feature_rich_encoder_forward(inputs, lengths, emb_table, lstm_params):
    """Full module forward: embedding -> dropout(identity) -> biLSTM."""
    embedded = jnp.take(emb_table, inputs, axis=0).astype(jnp.float32)
    # dropout: identity (eval mode)
    return bilstm_pallas(embedded, lengths, lstm_params)


# ----------------------------- pure-JAX reference ---------------------------
def _lstm_cell_ref(x, h, c, w_ih, w_hh, b):
    H = h.shape[-1]
    gates = x @ w_ih + h @ w_hh + b
    i = jax.nn.sigmoid(gates[:, 0 * H:1 * H])
    f = jax.nn.sigmoid(gates[:, 1 * H:2 * H])
    g = jnp.tanh(gates[:, 2 * H:3 * H])
    o = jax.nn.sigmoid(gates[:, 3 * H:4 * H])
    c_new = f * c + i * g
    h_new = o * jnp.tanh(c_new)
    return h_new, c_new


def _reference(embedded, lengths, params):
    B, T, H = embedded.shape
    w_ih_f, w_hh_f, b_f, w_ih_b, w_hh_b, b_b = params
    hf = jnp.zeros((B, H), jnp.float32)
    cf = jnp.zeros((B, H), jnp.float32)
    hb = jnp.zeros((B, H), jnp.float32)
    cb = jnp.zeros((B, H), jnp.float32)
    out_f = [None] * T
    out_b = [None] * T
    for t in range(T):
        h_new, c_new = _lstm_cell_ref(embedded[:, t], hf, cf, w_ih_f, w_hh_f, b_f)
        m = (t < lengths)[:, None]
        hf = jnp.where(m, h_new, hf)
        cf = jnp.where(m, c_new, cf)
        out_f[t] = jnp.where(m, h_new, 0.0)
    for t in range(T - 1, -1, -1):
        h_new, c_new = _lstm_cell_ref(embedded[:, t], hb, cb, w_ih_b, w_hh_b, b_b)
        m = (t < lengths)[:, None]
        hb = jnp.where(m, h_new, hb)
        cb = jnp.where(m, c_new, cb)
        out_b[t] = jnp.where(m, h_new, 0.0)
    output = jnp.concatenate(
        [jnp.stack(out_f, axis=1), jnp.stack(out_b, axis=1)], axis=-1)
    hidden = jnp.stack([hf, hb], axis=0)
    return output, hidden


if __name__ == "__main__":
    # Small shapes consistent with the module.
    VOCAB = 16      # input_size
    H = 32          # hidden_size
    B = 4           # batch
    T = 8           # padded sequence length (max length present in batch)

    key = jax.random.PRNGKey(0)
    k_emb, k_tok, k_p = jax.random.split(key, 3)

    # Deterministic parameter init (PyTorch-like scales). Weights supplied
    # pre-transposed as (H, 4H) with torch gate order i, f, g, o; bias is the
    # combined b_ih + b_hh.
    emb_table = jax.random.normal(k_emb, (VOCAB, H), jnp.float32)
    scale = 1.0 / jnp.sqrt(jnp.float32(H))
    kk = jax.random.split(k_p, 6)
    w_ih_f = jax.random.uniform(kk[0], (H, 4 * H), jnp.float32, -scale, scale)
    w_hh_f = jax.random.uniform(kk[1], (H, 4 * H), jnp.float32, -scale, scale)
    b_f = jax.random.uniform(kk[2], (1, 4 * H), jnp.float32, -scale, scale)
    w_ih_b = jax.random.uniform(kk[3], (H, 4 * H), jnp.float32, -scale, scale)
    w_hh_b = jax.random.uniform(kk[4], (H, 4 * H), jnp.float32, -scale, scale)
    b_b = jax.random.uniform(kk[5], (1, 4 * H), jnp.float32, -scale, scale)
    lstm_params = (w_ih_f, w_hh_f, b_f, w_ih_b, w_hh_b, b_b)

    inputs = jax.random.randint(k_tok, (B, T), 0, VOCAB, jnp.int32)
    lengths = jnp.array([T, 5, 3, T], jnp.int32)  # variable lengths, max == T

    output, hidden = jax.jit(feature_rich_encoder_forward)(
        inputs, lengths, emb_table, lstm_params)
    jax.block_until_ready((output, hidden))

    assert output.shape == (B, T, 2 * H), output.shape
    assert hidden.shape == (2, B, H), hidden.shape

    # Verify against a pure-f32 JAX reference of the same semantics
    # (kernel uses bf16 MXU inputs with f32 accumulation -> looser tolerance).
    embedded = jnp.take(emb_table, inputs, axis=0).astype(jnp.float32)
    ref_out, ref_hid = _reference(embedded, lengths, lstm_params)
    assert jnp.allclose(output, ref_out, atol=2e-2, rtol=2e-2), \
        float(jnp.max(jnp.abs(output - ref_out)))
    assert jnp.allclose(hidden, ref_hid, atol=2e-2, rtol=2e-2), \
        float(jnp.max(jnp.abs(hidden - ref_hid)))

    print("KERNEL_OK")
</pallas_src>

<mosaic_0001>
module attributes {stable_mosaic.version = 11 : i64} {
  func.func @bilstm_dir_kernel(%arg0: i32, %arg1: memref<1xi32, #tpu.memory_space<smem>>, %arg2: memref<8x1xi32, #tpu.memory_space<vmem>>, %arg3: memref<64x32xbf16, #tpu.memory_space<vmem>>, %arg4: memref<1x32x128xbf16, #tpu.memory_space<vmem>>, %arg5: memref<1x32x128xbf16, #tpu.memory_space<vmem>>, %arg6: memref<1x1x128xf32, #tpu.memory_space<vmem>>, %arg7: memref<1x8x8x32xf32, #tpu.memory_space<vmem>>, %arg8: memref<1x8x32xf32, #tpu.memory_space<vmem>>, %arg9: memref<64x128xf32, #tpu.memory_space<vmem>>, %arg10: memref<8x32xf32, #tpu.memory_space<vmem>>, %arg11: memref<8x32xf32, #tpu.memory_space<vmem>>) attributes {dimension_semantics = [#tpu.dimension_semantics<parallel>], iteration_bounds = array<i64: 2>, scalar_prefetch = 1 : i64, scratch_operands = 3 : i64, tpu.core_type = #tpu.core_type<tc>, window_params = [{pipeline_mode = #tpu.pipeline_mode<synchronous>, transform_indices = @transform_0, window_bounds = array<i64: 8, 1>}, {pipeline_mode = #tpu.pipeline_mode<synchronous>, transform_indices = @transform_1, window_bounds = array<i64: 64, 32>}, {transform_indices = @transform_2, window_bounds = array<i64: 1, 32, 128>}, {transform_indices = @transform_3, window_bounds = array<i64: 1, 32, 128>}, {transform_indices = @transform_4, window_bounds = array<i64: 1, 1, 128>}, {transform_indices = @transform_5, window_bounds = array<i64: 1, 8, 8, 32>}, {transform_indices = @transform_6, window_bounds = array<i64: 1, 8, 32>}]} {
    %c0 = arith.constant 0 : index
    %0 = memref.load %arg1[%c0] : memref<1xi32, #tpu.memory_space<smem>>
    %c0_0 = arith.constant 0 : index
    %c0_1 = arith.constant 0 : index
    %1 = vector.load %arg3[%c0_0, %c0_1] : memref<64x32xbf16, #tpu.memory_space<vmem>>, vector<64x32xbf16>
    %c0_2 = arith.constant 0 : index
    %c0_3 = arith.constant 0 : index
    %c0_4 = arith.constant 0 : index
    %2 = vector.load %arg4[%c0_2, %c0_3, %c0_4] : memref<1x32x128xbf16, #tpu.memory_space<vmem>>, vector<1x32x128xbf16>
    %3 = vector.shape_cast %2 : vector<1x32x128xbf16> to vector<32x128xbf16>
    %cst = arith.constant dense<0.000000e+00> : vector<64x128xf32>
    %4 = tpu.matmul %1, %3, %cst {dimension_numbers = #tpu.dot_dimension_numbers<[1], [0], [0], [1], [0, 0, 1, 1], [], []>} : vector<64x32xbf16>, vector<32x128xbf16>, vector<64x128xf32> -> vector<64x128xf32>
    %c0_5 = arith.constant 0 : index
    %c0_6 = arith.constant 0 : index
    %c0_7 = arith.constant 0 : index
    %5 = vector.load %arg6[%c0_5, %c0_6, %c0_7] : memref<1x1x128xf32, #tpu.memory_space<vmem>>, vector<1x1x128xf32>
    %6 = vector.shape_cast %5 : vector<1x1x128xf32> to vector<1x128xf32>
    %7 = vector.broadcast %6 : vector<1x128xf32> to vector<64x128xf32>
    %8 = arith.addf %4, %7 : vector<64x128xf32>
    %c0_8 = arith.constant 0 : index
    %c0_9 = arith.constant 0 : index
    %9 = vector.load %arg9[%c0_8, %c0_9] : memref<64x128xf32, #tpu.memory_space<vmem>>, vector<64x128xf32>
    tpu.vector_store %arg9[%c0_8, %c0_9], %8 {strides = array<i32>} : memref<64x128xf32, #tpu.memory_space<vmem>>, vector<64x128xf32>,
    %cst_10 = arith.constant 0.000000e+00 : f32
    %10 = vector.broadcast %cst_10 : f32 to vector<8x32xf32>
    %c0_11 = arith.constant 0 : index
    %c0_12 = arith.constant 0 : index
    %11 = vector.load %arg10[%c0_11, %c0_12] : memref<8x32xf32, #tpu.memory_space<vmem>>, vector<8x32xf32>
    tpu.vector_store %arg10[%c0_11, %c0_12], %10 {strides = array<i32>} : memref<8x32xf32, #tpu.memory_space<vmem>>, vector<8x32xf32>,
    %cst_13 = arith.constant 0.000000e+00 : f32
    %12 = vector.broadcast %cst_13 : f32 to vector<8x32xf32>
    %c0_14 = arith.constant 0 : index
    %c0_15 = arith.constant 0 : index
    %13 = vector.load %arg11[%c0_14, %c0_15] : memref<8x32xf32, #tpu.memory_space<vmem>>, vector<8x32xf32>
    tpu.vector_store %arg11[%c0_14, %c0_15], %12 {strides = array<i32>} : memref<8x32xf32, #tpu.memory_space<vmem>>, vector<8x32xf32>,
    %cst_16 = arith.constant 0.000000e+00 : f32
    %14 = vector.broadcast %cst_16 : f32 to vector<8x8x32xf32>
    %c0_17 = arith.constant 0 : index
    %c0_18 = arith.constant 0 : index
    %c0_19 = arith.constant 0 : index
    %c0_20 = arith.constant 0 : index
    %15 = vector.load %arg7[%c0_17, %c0_18, %c0_19, %c0_20] : memref<1x8x8x32xf32, #tpu.memory_space<vmem>>, vector<1x8x8x32xf32>
    %16 = vector.shape_cast %15 : vector<1x8x8x32xf32> to vector<8x8x32xf32>
    %17 = vector.shape_cast %14 : vector<8x8x32xf32> to vector<1x8x8x32xf32>
    tpu.vector_store %arg7[%c0_17, %c0_18, %c0_19, %c0_20], %17 {strides = array<i32>} : memref<1x8x8x32xf32, #tpu.memory_space<vmem>>, vector<1x8x8x32xf32>,
    %c0_21 = arith.constant 0 : index
    %c0_22 = arith.constant 0 : index
    %18 = vector.load %arg2[%c0_21, %c0_22] : memref<8x1xi32, #tpu.memory_space<vmem>>, vector<8x1xi32>
    %c0_23 = arith.constant 0 : index
    %c0_24 = arith.constant 0 : index
    %c0_25 = arith.constant 0 : index
    %19 = vector.load %arg5[%c0_23, %c0_24, %c0_25] : memref<1x32x128xbf16, #tpu.memory_space<vmem>>, vector<1x32x128xbf16>
    %20 = vector.shape_cast %19 : vector<1x32x128xbf16> to vector<32x128xbf16>
    %c0_i32 = arith.constant 0 : i32
    %21 = arith.cmpi eq, %arg0, %c0_i32 : i32
    %c0_i32_26 = arith.constant 0 : i32
    %c0_i32_27 = arith.constant 0 : i32
    %22 = arith.subi %0, %c0_i32_27 : i32
    %23 = arith.addi %c0_i32_27, %22 : i32
    %c1_i32 = arith.constant 1 : i32
    scf.for %arg12 = %c0_i32_27 to %23 step %c1_i32  : i32 {
      %c1_i32_33 = arith.constant 1 : i32
      %28 = arith.subi %0, %c1_i32_33 : i32
      %29 = arith.subi %28, %arg12 : i32
      %30 = arith.select %21, %arg12, %29 : i32
      %c8_i32 = arith.constant 8 : i32
      %31 = arith.muli %30, %c8_i32 : i32
      %32 = tpu.assume_multiple %31, 8 : i32
      %33 = arith.index_cast %32 : i32 to index
      %c0_34 = arith.constant 0 : index
      %34 = vector.load %arg9[%33, %c0_34] : memref<64x128xf32, #tpu.memory_space<vmem>>, vector<8x128xf32>
      %c0_35 = arith.constant 0 : index
      %c0_36 = arith.constant 0 : index
      %35 = vector.load %arg10[%c0_35, %c0_36] : memref<8x32xf32, #tpu.memory_space<vmem>>, vector<8x32xf32>
      %36 = arith.truncf %35 : vector<8x32xf32> to vector<8x32xbf16>
      %cst_37 = arith.constant dense<0.000000e+00> : vector<8x128xf32>
      %37 = tpu.matmul %36, %20, %cst_37 {dimension_numbers = #tpu.dot_dimension_numbers<[1], [0], [0], [1], [0, 0, 1, 1], [], []>} : vector<8x32xbf16>, vector<32x128xbf16>, vector<8x128xf32> -> vector<8x128xf32>
      %38 = arith.addf %34, %37 : vector<8x128xf32>
      %39 = vector.extract_strided_slice %38 {offsets = [0, 0], sizes = [8, 32], strides = [1, 1]} : vector<8x128xf32> to vector<8x32xf32>
      %40 = arith.negf %39 : vector<8x32xf32>
      %41 = math.exp %40 : vector<8x32xf32>
      %cst_38 = arith.constant 1.000000e+00 : f32
      %42 = vector.broadcast %cst_38 : f32 to vector<8x32xf32>
      %43 = arith.addf %42, %41 : vector<8x32xf32>
      %44 = arith.divf %42, %43 : vector<8x32xf32>
      %45 = vector.extract_strided_slice %38 {offsets = [0, 32], sizes = [8, 32], strides = [1, 1]} : vector<8x128xf32> to vector<8x32xf32>
      %46 = arith.negf %45 : vector<8x32xf32>
      %47 = math.exp %46 : vector<8x32xf32>
      %cst_39 = arith.constant 1.000000e+00 : f32
      %48 = vector.broadcast %cst_39 : f32 to vector<8x32xf32>
      %49 = arith.addf %48, %47 : vector<8x32xf32>
      %50 = arith.divf %48, %49 : vector<8x32xf32>
      %51 = vector.extract_strided_slice %38 {offsets = [0, 64], sizes = [8, 32], strides = [1, 1]} : vector<8x128xf32> to vector<8x32xf32>
      %52 = math.tanh %51 : vector<8x32xf32>
      %53 = vector.extract_strided_slice %38 {offsets = [0, 96], sizes = [8, 32], strides = [1, 1]} : vector<8x128xf32> to vector<8x32xf32>
      %54 = arith.negf %53 : vector<8x32xf32>
      %55 = math.exp %54 : vector<8x32xf32>
      %cst_40 = arith.constant 1.000000e+00 : f32
      %56 = vector.broadcast %cst_40 : f32 to vector<8x32xf32>
      %57 = arith.addf %56, %55 : vector<8x32xf32>
      %58 = arith.divf %56, %57 : vector<8x32xf32>
      %c0_41 = arith.constant 0 : index
      %c0_42 = arith.constant 0 : index
      %59 = vector.load %arg11[%c0_41, %c0_42] : memref<8x32xf32, #tpu.memory_space<vmem>>, vector<8x32xf32>
      %60 = arith.mulf %50, %59 : vector<8x32xf32>
      %61 = arith.mulf %44, %52 : vector<8x32xf32>
      %62 = arith.addf %60, %61 : vector<8x32xf32>
      %63 = math.tanh %62 : vector<8x32xf32>
      %64 = arith.mulf %58, %63 : vector<8x32xf32>
      %65 = vector.broadcast %30 : i32 to vector<8x1xi32>
      %66 = arith.cmpi slt, %65, %18 : vector<8x1xi32>
      %c0_43 = arith.constant 0 : index
      %c0_44 = arith.constant 0 : index
      %67 = vector.load %arg10[%c0_43, %c0_44] : memref<8x32xf32, #tpu.memory_space<vmem>>, vector<8x32xf32>
      %68 = vector.shape_cast %66 : vector<8x1xi1> to vector<8x1xi1>
      %69 = vector.broadcast %68 : vector<8x1xi1> to vector<8x32xi1>
      %70 = arith.select %69, %64, %67 : vector<8x32xi1>, vector<8x32xf32>
      %c0_45 = arith.constant 0 : index
      %c0_46 = arith.constant 0 : index
      %71 = vector.load %arg10[%c0_45, %c0_46] : memref<8x32xf32, #tpu.memory_space<vmem>>, vector<8x32xf32>
      tpu.vector_store %arg10[%c0_45, %c0_46], %70 {strides = array<i32>} : memref<8x32xf32, #tpu.memory_space<vmem>>, vector<8x32xf32>,
      %c0_47 = arith.constant 0 : index
      %c0_48 = arith.constant 0 : index
      %72 = vector.load %arg11[%c0_47, %c0_48] : memref<8x32xf32, #tpu.memory_space<vmem>>, vector<8x32xf32>
      %73 = vector.shape_cast %66 : vector<8x1xi1> to vector<8x1xi1>
      %74 = vector.broadcast %73 : vector<8x1xi1> to vector<8x32xi1>
      %75 = arith.select %74, %62, %72 : vector<8x32xi1>, vector<8x32xf32>
      %c0_49 = arith.constant 0 : index
      %c0_50 = arith.constant 0 : index
      %76 = vector.load %arg11[%c0_49, %c0_50] : memref<8x32xf32, #tpu.memory_space<vmem>>, vector<8x32xf32>
      tpu.vector_store %arg11[%c0_49, %c0_50], %75 {strides = array<i32>} : memref<8x32xf32, #tpu.memory_space<vmem>>, vector<8x32xf32>,
      %cst_51 = arith.constant 0.000000e+00 : f32
      %77 = vector.shape_cast %66 : vector<8x1xi1> to vector<8x1xi1>
      %78 = vector.broadcast %77 : vector<8x1xi1> to vector<8x32xi1>
      %79 = vector.broadcast %cst_51 : f32 to vector<8x32xf32>
      %80 = arith.select %78, %64, %79 : vector<8x32xi1>, vector<8x32xf32>
      %c0_52 = arith.constant 0 : index
      %81 = arith.index_cast %30 : i32 to index
      %c0_53 = arith.constant 0 : index
      %c0_54 = arith.constant 0 : index
      %82 = vector.load %arg7[%c0_52, %81, %c0_53, %c0_54] : memref<1x8x8x32xf32, #tpu.memory_space<vmem>>, vector<1x1x8x32xf32>
      %83 = vector.shape_cast %82 : vector<1x1x8x32xf32> to vector<8x32xf32>
      %84 = vector.shape_cast %80 : vector<8x32xf32> to vector<1x1x8x32xf32>
      tpu.vector_store %arg7[%c0_52, %81, %c0_53, %c0_54], %84 {strides = array<i32>} : memref<1x8x8x32xf32, #tpu.memory_space<vmem>>, vector<1x1x8x32xf32>,
    }
    %c0_28 = arith.constant 0 : index
    %c0_29 = arith.constant 0 : index
    %24 = vector.load %arg10[%c0_28, %c0_29] : memref<8x32xf32, #tpu.memory_space<vmem>>, vector<8x32xf32>
    %c0_30 = arith.constant 0 : index
    %c0_31 = arith.constant 0 : index
    %c0_32 = arith.constant 0 : index
    %25 = vector.load %arg8[%c0_30, %c0_31, %c0_32] : memref<1x8x32xf32, #tpu.memory_space<vmem>>, vector<1x8x32xf32>
    %26 = vector.shape_cast %25 : vector<1x8x32xf32> to vector<8x32xf32>
    %27 = vector.shape_cast %24 : vector<8x32xf32> to vector<1x8x32xf32>
    tpu.vector_store %arg8[%c0_30, %c0_31, %c0_32], %27 {strides = array<i32>} : memref<1x8x32xf32, #tpu.memory_space<vmem>>, vector<1x8x32xf32>,
    return
  }
  func.func @transform_0(%arg0: i32, %arg1: memref<1xi32, #tpu.memory_space<smem>>) -> (i32, i32) {
    %c0_i32 = arith.constant 0 : i32
    %c0_i32_0 = arith.constant 0 : i32
    %c0_i32_1 = arith.constant 0 : i32
    return %c0_i32, %c0_i32_0 : i32, i32
  }
  func.func @transform_1(%arg0: i32, %arg1: memref<1xi32, #tpu.memory_space<smem>>) -> (i32, i32) {
    %c0_i32 = arith.constant 0 : i32
    %c0_i32_0 = arith.constant 0 : i32
    %c0_i32_1 = arith.constant 0 : i32
    return %c0_i32, %c0_i32_0 : i32, i32
  }
  func.func @transform_2(%arg0: i32, %arg1: memref<1xi32, #tpu.memory_space<smem>>) -> (i32, i32, i32) {
    %c0_i32 = arith.constant 0 : i32
    %c0_i32_0 = arith.constant 0 : i32
    %c0_i32_1 = arith.constant 0 : i32
    return %arg0, %c0_i32, %c0_i32_0 : i32, i32, i32
  }
  func.func @transform_3(%arg0: i32, %arg1: memref<1xi32, #tpu.memory_space<smem>>) -> (i32, i32, i32) {
    %c0_i32 = arith.constant 0 : i32
    %c0_i32_0 = arith.constant 0 : i32
    %c0_i32_1 = arith.constant 0 : i32
    return %arg0, %c0_i32, %c0_i32_0 : i32, i32, i32
  }
  func.func @transform_4(%arg0: i32, %arg1: memref<1xi32, #tpu.memory_space<smem>>) -> (i32, i32, i32) {
    %c0_i32 = arith.constant 0 : i32
    %c0_i32_0 = arith.constant 0 : i32
    %c0_i32_1 = arith.constant 0 : i32
    return %arg0, %c0_i32, %c0_i32_0 : i32, i32, i32
  }
  func.func @transform_5(%arg0: i32, %arg1: memref<1xi32, #tpu.memory_space<smem>>) -> (i32, i32, i32, i32) {
    %c0_i32 = arith.constant 0 : i32
    %c0_i32_0 = arith.constant 0 : i32
    %c0_i32_1 = arith.constant 0 : i32
    %c0_i32_2 = arith.constant 0 : i32
    return %arg0, %c0_i32, %c0_i32_0, %c0_i32_1 : i32, i32, i32, i32
  }
  func.func @transform_6(%arg0: i32, %arg1: memref<1xi32, #tpu.memory_space<smem>>) -> (i32, i32, i32) {
    %c0_i32 = arith.constant 0 : i32
    %c0_i32_0 = arith.constant 0 : i32
    %c0_i32_1 = arith.constant 0 : i32
    return %arg0, %c0_i32, %c0_i32_0 : i32, i32, i32
  }
}

</mosaic_0001>

<bundles_post_ra>
// kernel: feature_rich_encoder_forward.1
= control target key start
LH: loop header
LB: loop body
LE: loop exit
PB: predicated region body
PF: predicated region fallthrough
CT: control target
= control target key end

     0   :  { %s879_s26 = smov 0   ;;  %s1009_s0 = inlined_call_operand.<no memory space> [shape: s32[1], index: 0, kind: input, shape index: {}]   ;;  %s1010_s1 = inlined_call_operand.vmem [shape: s32[8,1], index: 1, kind: input, shape index: {}]   ;;  %s1011_s2 = inlined_call_operand.vmem [shape: bf16[64,32], index: 2, kind: input, shape index: {}]   ;;  %s1012_s3 = inlined_call_operand.vmem [shape: bf16[2,32,128], index: 3, kind: input, shape index: {}]   ;;  %s1013_s4 = inlined_call_operand.vmem [shape: bf16[2,32,128], index: 4, kind: input, shape index: {}]   ;;  %s1014_s5 = inlined_call_operand.vmem [shape: f32[2,1,128], index: 5, kind: input, shape index: {}]   ;;  %s1015_s6 = inlined_call_operand.vmem [shape: f32[2,8,8,32], index: 6, kind: output, shape index: {0}]   ;;  %s1016_s7 = inlined_call_operand.vmem [shape: f32[2,8,32], index: 7, kind: output, shape index: {1}]  }
   0x1   :  { %13 = sst [smem:[#allocation6]] %s1009_s0 }
   0x2 LB: > { %s885_s27 = sadd.s32 4294967295, %s823_s26   ;;  %p710_p0 = scmp.ge.s32.totalorder %s823_s26, 1  ;;  %s823_s26 = sphi %s879_s26, %s19_s26  }
   0x3   : > { %p235_p1 = scmp.lt.s32.totalorder %s823_s26, 3 }
   0x5   : > { %p236_p2 = pnand %p710_p0, %p235_p1 }
   0x6   : > { %p277_p3 = scmp.lt.s32.totalorder (!%p236_p2), %s885_s27, 1  ;;  %s890_s0 = sld [smem:[#allocation6]] (!%p236_p2)  ;;  %vm352_vm0 = vcmask (!%p236_p2), 261120   ;;  %v799_v0 = vld [vmem:[%s1011_s2] sm:$0xff] (!%p236_p2)   ;;  %v829_v1 = vmov (!%p236_p2), 0.0   ;;  %v800_v2 = vld [vmem:[%s1011_s2 + $0x10] sm:$0xff] (!%p236_p2)  }
   0x7   : > { %239 = sbr.rel (%p236_p2) target bundleno = 966 (0x3c6), region = 40  ;;  %438 = vst.msk [vmem:[#allocation3] sm:$0xff] (!%p236_p2), %vm352_vm0, %v829_v1  ;;  %439 = vst.msk [vmem:[#allocation4] sm:$0xff] (!%p236_p2), %vm352_vm0, %v829_v1  ;;  %754 = vmatprep.mubr.msk.bf16.mxu0 (!%p236_p2), %vm352_vm0, %v799_v0  ;;  %758 = vmatprep.mubr.msk.bf16.mxu1 (!%p236_p2), %vm352_vm0, %v800_v2  ;;  %v801_v9 = vld [vmem:[%s1011_s2 + $0x8] sm:$0xff] (!%p236_p2)   ;;  %v802_v10 = vld [vmem:[%s1011_s2 + $0x18] sm:$0xff] (!%p236_p2)   ;;  %p453_p4 = scmp.eq.s32.totalorder (!%p236_p2), %s885_s27, 0 }
   0x8   : > { %v959_v11 = vld [vmem:[%s1010_s1] sm:$0xff] (!%p236_p2) }
   0xc   : > { %p729_p5 = scmp.le.s32.totalorder (!%p236_p2), %s890_s0, 0 }
   0xe   : > { %s898_s30 = scalar_select %p277_p3, %s885_s27, 1 }
  0x10   : > { %s738_s10 = sshll.u32 %s898_s30, 4  ;;  %s740_s11 = sshll.u32 %s898_s30, 6 }
  0x11   : > { %s281_s14 = scalar_lea.vmem %s1012_s3, %s738_s10  ;;  %s286_s17 = scalar_lea.vmem %s1013_s4, %s738_s10 }
  0x12   : > { %s916_s20 = scalar_lea.vmem %s1015_s6, %s740_s11  ;;  %s717_s21 = sshll.u32 %s898_s30, 3  ;;  %v797_v3 = vld [vmem:[%s281_s14] sm:$0xff]   ;;  %v944_v6 = vld [vmem:[%s286_s17 + $0x8] sm:$0xf]  ;;  %v946_v7 = vld [vmem:[%s286_s17 + $0xc] sm:$0xf] }
  0x13   : > { %s922_s24 = scalar_lea.vmem %s1016_s7, %s717_s21  ;;  %440 = vst.msk [vmem:[%s916_s20] sm:$0xff] %vm352_vm0, %v829_v1  ;;  %441 = vst.msk [vmem:[%s916_s20 + $0x8] sm:$0xff] %vm352_vm0, %v829_v1  ;;  %v940_v4 = vld [vmem:[%s286_s17] sm:$0xf]  ;;  %v942_v5 = vld [vmem:[%s286_s17 + $0x4] sm:$0xf]  ;;  %750 = vmatprep.subr.bf16.mxu0 %v797_v3  ;;  %770 = vmatprep.subr.bf16.mxu1 %v797_v3  ;;  %s289_s13 = scalar_lea.vmem %s1014_s5, %s898_s30 }
  0x14   : > { %442 = vst.msk [vmem:[%s916_s20 + $0x10] sm:$0xff] %vm352_vm0, %v829_v1  ;;  %443 = vst.msk [vmem:[%s916_s20 + $0x18] sm:$0xff] %vm352_vm0, %v829_v1  ;;  %751 = vmatpush3.bf16.msra.mxu0 %v797_v3  ;;  %772 = vmatpush3.bf16.msra.mxu1 %v797_v3  ;;  %v798_v8 = vld [vmem:[%s281_s14 + $0x8] sm:$0xff]   ;;  %v718_v12 = vld [vmem:[%s289_s13] ss:$0 sm:$0xff]  ;;  %s967_s30 = smov (!%p729_p5), 0  }
  0x15   : > { %444 = vst.msk [vmem:[%s916_s20 + $0x20] sm:$0xff] %vm352_vm0, %v829_v1  ;;  %445 = vst.msk [vmem:[%s916_s20 + $0x28] sm:$0xff] %vm352_vm0, %v829_v1  ;;  %752 = vmatprep.subr.bf16.mxu0 %v798_v8  ;;  %771 = vmatprep.subr.bf16.mxu1 %v798_v8 }
  0x16   : > { %446 = vst.msk [vmem:[%s916_s20 + $0x30] sm:$0xff] %vm352_vm0, %v829_v1  ;;  %447 = vst.msk [vmem:[%s916_s20 + $0x38] sm:$0xff] %vm352_vm0, %v829_v1 }
  0x18   : > { %753 = vmatpush3.bf16.msra.mxu0 %v798_v8  ;;  %773 = vmatpush3.bf16.msra.mxu1 %v798_v8 }
  0x1b   : > { %755 = vmatmul.mubr.msk.bf16.vlgmr.msra.gmra.mrb[0].mxu0 %vm352_vm0, %v801_v9  ;;  %759 = vmatmul.mubr.msk.bf16.vlgmr.msra.gmra.mrb[0].mxu1 %vm352_vm0, %v802_v10 }
  0xee   : > { %v756_v13 = vpop.f32.mrb[0].mxu0  ;;  %v760_v14 = vpop.f32.mrb[0].mxu1  ;;  %662 = sbr.rel (%p729_p5) target bundleno = 962 (0x3c2), region = 91 }
  0xef   : > { %v408_v15 = vadd.f32 %v756_v13, %v718_v12  ;;  %v424_v16 = vadd.f32 %v760_v14, %v718_v12  ;;  %v399_v17 = vpop.f32.mrb[1].mxu0  ;;  %v415_v18 = vpop.f32.mrb[1].mxu1 }
  0xf0   : > { %v400_v19 = vadd.f32 %v718_v12, %v399_v17  ;;  %v416_v20 = vadd.f32 %v718_v12, %v415_v18  ;;  %v757_v21 = vpop.f32.mrb[2].mxu0  ;;  %v761_v22 = vpop.f32.mrb[2].mxu1 }
  0xf1   : > { %432 = vst [vmem:[#allocation2 + $0x10] sm:$0xff] %v408_v15  ;;  %436 = vst [vmem:[#allocation2 + $0x30] sm:$0xff] %v424_v16  ;;  %v411_v23 = vadd.f32 %v757_v21, %v718_v12  ;;  %v427_v24 = vadd.f32 %v761_v22, %v718_v12  ;;  %v402_v25 = vpop.f32.mrb[3].mxu0  ;;  %v418_v26 = vpop.f32.mrb[3].mxu1 }
  0xf2   : > { %430 = vst [vmem:[#allocation2] sm:$0xff] %v400_v19  ;;  %434 = vst [vmem:[#allocation2 + $0x20] sm:$0xff] %v416_v20  ;;  %v403_v27 = vadd.f32 %v718_v12, %v402_v25  ;;  %v419_v28 = vadd.f32 %v718_v12, %v418_v26 }
  0xf3   : > { %433 = vst [vmem:[#allocation2 + $0x18] sm:$0xff] %v411_v23  ;;  %437 = vst [vmem:[#allocation2 + $0x38] sm:$0xff] %v427_v24 }
  0xf4   : > { %431 = vst [vmem:[#allocation2 + $0x8] sm:$0xff] %v403_v27  ;;  %435 = vst [vmem:[#allocation2 + $0x28] sm:$0xff] %v419_v28 }
  0xf5 LB: >> { %v732_v29 = vcombine.low %v940_v4, %v942_v5  ;;  %v830_v30 = vmov 0.0   ;;  %vm831_vm1 = vmmov 0   ;;  %v733_v31 = vcombine.low %v944_v6, %v946_v7  ;;  %v466_v32 = vld [vmem:[#allocation3] sm:$0xff]  ;;  %s730_s14 = sadd.s32 4294967295, %s890_s0  ;;  %s833_s19 = smov 64   ;;  %v531_v42 = vld [vmem:[#allocation4] sm:$0xff]  ;;  %s827_s30 = sphi %s967_s30, %s457_s30  }
  0xf6   : >> { %762 = vmatprep.subr.bf16.mxu0 %v830_v30  ;;  %766 = vmatprep.mubr.msk.bf16.mxu0 %vm831_vm1, %v830_v30  ;;  %v467_v33 = vpack.c.bf16 %v466_v32, %v466_v32  ;;  %s461_s15 = ssub.s32 %s730_s14, %s827_s30  ;;  %v832_v40 = vmov 0   ;;  %s834_s21 = smov 32  }
  0xf7   : >> { %763 = vmatpush3.bf16.msra.mxu0 %v732_v29  ;;  %s982_s16 = scalar_select %p453_p4, %s827_s30, %s461_s15  ;;  %803 = vset.pattern.permute.xlu1 %v832_v40 }
  0xf8   : >> { %764 = vmatprep.subr.bf16.mxu0 %v830_v30  ;;  %804 = vset.pattern.permute.xlu0 %v832_v40  ;;  %s835_s22 = smov 96   ;;  %s457_s30 = sadd.s32 1, %s827_s30  }
  0xf9   : >> { %s731_s17 = sshll.u32 %s982_s16, 3  ;;  %v553_v46 = vstv %s982_s16  ;;  %p456_p6 = scmp.ge.s32.totalorder %s457_s30, %s890_s0 }
  0xfa   : >> { %s464_s18 = scalar_lea.vmem [#allocation2], %s731_s17  ;;  %vm554_vm2 = vcmp.lt.s32.totalorder %v553_v46, %v959_v11  ;;  %s586_s23 = scalar_lea.vmem %s916_s20, %s731_s17 }
  0xfb   : >> { %765 = vmatpush3.bf16.msra.mxu0 %v733_v31  ;;  %v465_v34 = vld [vmem:[%s464_s18] sm:$0xff]  ;;  %v555_v50 = vsel %vm554_vm2, 1, %v832_v40 }
  0xfe   : >> { %767 = vmatmul.mubr.msk.bf16.vlgmr.msra.gmra.mrb[0].mxu0 %vm352_vm0, %v467_v33 }
 0x1d1   : >> { %v517_v35 = vpop.f32.mrb[0].mxu0 }
 0x1d2   : >> { %v523_v36 = vadd.f32 %v517_v35, %v465_v34  ;;  %v768_v37 = vpop.f32.mrb[1].mxu0 }
 0x1d3   : >> { %v520_v38 = vpop.f32.mrb[2].mxu0 }
 0x1d4   : >> { %805 = vtanh.f32 %v523_v36  ;;  %v769_v39 = vpop.f32.mrb[3].mxu0  ;;  %v735_v43 = vmul.f32 -1.442695, %v523_v36 }
 0x1d6   : >> { %807 = vpow2.f32 %v735_v43 }
 0x1de   : >> { %v806_v41 = vpop.eup %805 }
 0x1df   : >> { %538 = vrot.lane.b32.xlu0 %v806_v41, %s833_s19 }
 0x1e0   : >> { %v808_v44 = vpop.eup %807 }
 0x1e1   : >> { %v527_v45 = vadd.f32 1.0, %v808_v44 }
 0x1e3   : >> { %533 = vrot.lane.b32.xlu0 %v531_v42, %s834_s21  ;;  %809 = vrcp.f32 %v527_v45 }
 0x1ed   : >> { %v810_v47 = vpop.eup %809 }
 0x251   : >> { %v539_v48 = vpop.permute.xlu0 %538 }
 0x252   : >> { %v541_v49 = vmul.f32 %v810_v47, %v539_v48 }
 0x254   : >> { %543 = vrot.lane.b32.xlu1 %v541_v49, %s834_s21 }
 0x255   : >> { %v534_v51 = vpop.permute.xlu0 %533 }
 0x256   : >> { %v536_v52 = vmul.f32 %v810_v47, %v534_v51 }
 0x258   : >> { %557 = vperm.xlu1 %803, %v555_v50  }
 0x25c   : >> { %561 = vrot.lane.b32.xlu1 %v466_v32, %s835_s22 }
 0x2c6   : >> { %v544_v53 = vpop.permute.xlu1 %543 }
 0x2c7   : >> { %v546_v54 = vadd.f32 %v544_v53, %v536_v52 }
 0x2c9   : >> { %811 = vtanh.f32 %v546_v54 }
 0x2d3   : >> { %v812_v55 = vpop.eup %811 }
 0x2d4   : >> { %549 = vrot.lane.b32.xlu0 %v812_v55, %s833_s19 }
 0x2d7   : >> { %v558_v56 = vpop.permute.xlu1 %557 }
 0x2d8   : >> { %572 = vrot.lane.b32.xlu0 %v531_v42, %s834_s21  ;;  %vm559_vm3 = vcmp.eq.s32.totalorder %v558_v56, 1 }
 0x2db   : >> { %v562_v58 = vpop.permute.xlu1 %561 }
 0x346   : >> { %v550_v57 = vpop.permute.xlu0 %549 }
 0x347   : >> { %v552_v59 = vmul.f32 %v810_v47, %v550_v57 }
 0x349   : >> { %v564_v60 = vsel %vm559_vm3, %v552_v59, %v562_v58  ;;  %v581_v63 = vsel %vm559_vm3, %v552_v59, 0.0 }
 0x34a   : >> { %566 = vrot.lane.b32.xlu1 %v564_v60, %s834_s21  ;;  %v573_v61 = vpop.permute.xlu0 %572 }
 0x34b   : >> { %v575_v62 = vsel %vm559_vm3, %v546_v54, %v573_v61 }
 0x34c   : >> { %577 = vrot.lane.b32.xlu0 %v575_v62, %s835_s22 }
 0x34e   : >> { %583 = vrot.lane.b32.xlu1 %v581_v63, %s834_s21 }
 0x3bb   : > { %459 = sbr.rel (!%p456_p6) target bundleno = 245 (0xf5), region = 97 }
 0x3bc   : >> { %v567_v0 = vpop.permute.xlu1 %566 }
 0x3bd   : >> { %569 = vst.msk [vmem:[#allocation3] sm:$0xff] %vm352_vm0, %v567_v0 }
 0x3be   : >> { %v578_v1 = vpop.permute.xlu0 %577 }
 0x3bf   : >> { %580 = vst.msk [vmem:[#allocation4] sm:$0xff] %vm352_vm0, %v578_v1 }
 0x3c0   : >> { %v584_v2 = vpop.permute.xlu1 %583 }
 0x3c1   : >> { %587 = vst.msk [vmem:[%s586_s23] sm:$0xff] %vm352_vm0, %v584_v2 }
 0x3c2 PF:  {}
 0x3c4   : > { %v588_v3 = vld [vmem:[#allocation3] sm:$0xff] }
 0x3c5   : > { %589 = vst.msk [vmem:[%s922_s24] sm:$0xff] %vm352_vm0, %v588_v3 }
 0x3c6 PF: > { %s19_s26 = sadd.s32 1, %s823_s26  }
 0x3c7   : > { %p16_p7 = scmp.ge.s32.totalorder %s19_s26, 4  }
 0x3c9   :  { %18 = sbr.rel (!%p16_p7) target bundleno = 2 (0x2), region = 108 }

</bundles_post_ra>
